<compile_context>
chip_gen: v5e
topology: v5e:2x2
jax: 0.10.0
libtpu: 0.0.40
codegen_flags: <defaults>
</compile_context>

<pallas_src>
import math

import jax
import jax.numpy as jnp
from jax import lax
from jax.experimental import pallas as pl
from jax.experimental.pallas import tpu as pltpu


def _einlinear_kernel(x_ref, w_ref, o_ref):
    # x_ref : (tm, E, I)   batch tile, all models
    # w_ref : (E,  O, I)   all per-model weights (resident across batch tiles)
    # o_ref : (tm, E, O)
    n_models = w_ref.shape[0]
    for e in range(n_models):                 # E is small & static -> unrolled
        xe = x_ref[:, e, :]                   # (tm, I)
        we = w_ref[e]                         # (O, I)
        # out[b, o] = sum_i xe[b, i] * we[o, i]: contract last dims of both
        # operands directly on the MXU -- no transpose anywhere.
        oe = lax.dot_general(
            xe, we,
            dimension_numbers=(((1,), (1,)), ((), ())),
            preferred_element_type=jnp.float32,
        )
        o_ref[:, e, :] = oe.astype(o_ref.dtype)


def _pick_batch_tile(B, E, I, O, itemsize, budget_bytes=12 << 20):
    """Largest batch tile whose (double-buffered) working set fits a conservative
    VMEM budget that is safe on v5e/v6e/v7x default scoped-VMEM limits."""
    w_bytes = 2 * E * O * I * itemsize            # weight block allocation
    per_row = 2 * E * (I + O) * itemsize          # double-buffered x + out rows
    tm = (budget_bytes - w_bytes) // max(per_row, 1)
    tm = int(min(B, max(8, tm)))
    if tm < B:
        tm = max(8, (tm // 8) * 8)
    return tm


def ein_linear(x, weight, *, compute_dtype=None, b_tile=None):
    """x: [B, E, I], weight: [E, O, I] -> [B, E, O] (== einsum('eoi,bei->beo'))."""
    B, E, I = x.shape
    E_w, O, I_w = weight.shape
    assert E == E_w and I == I_w

    out_dtype = x.dtype
    if compute_dtype is not None:
        # bf16 operands on v5e/v6e halve HBM/VMEM traffic and hit the native MXU;
        # accumulation stays f32 inside the kernel (preferred_element_type).
        x = x.astype(compute_dtype)
        weight = weight.astype(compute_dtype)

    itemsize = jnp.dtype(x.dtype).itemsize
    tm = b_tile if b_tile is not None else _pick_batch_tile(B, E, I, O, itemsize)
    grid = (pl.cdiv(B, tm),)

    return pl.pallas_call(
        _einlinear_kernel,
        out_shape=jax.ShapeDtypeStruct((B, E, O), out_dtype),
        grid_spec=pltpu.PrefetchScalarGridSpec(
            num_scalar_prefetch=0,
            grid=grid,
            in_specs=[
                # batch tile of x in its native [B, E, I] layout
                pl.BlockSpec((tm, E, I), lambda b: (b, 0, 0)),
                # full weight; constant block index -> stays resident in VMEM
                pl.BlockSpec((E, O, I), lambda b: (0, 0, 0)),
            ],
            out_specs=pl.BlockSpec((tm, E, O), lambda b: (b, 0, 0)),
        ),
        compiler_params=pltpu.CompilerParams(
            dimension_semantics=("parallel",),
        ),
    )(x, weight)


def init_einlinear_weight(key, n_models, out_features, in_features):
    """Deterministic kaiming_uniform_(a=sqrt(5)) style init (synthetic, not a checkpoint)."""
    # gain = sqrt(2 / (1 + a^2)) with a = sqrt(5) -> sqrt(1/3); bound = gain * sqrt(3/fan_in)
    fan_in = in_features
    bound = math.sqrt(2.0 / (1.0 + 5.0)) * math.sqrt(3.0 / fan_in)
    return jax.random.uniform(
        key, (n_models, out_features, in_features),
        minval=-bound, maxval=bound, dtype=jnp.float32,
    )


if __name__ == "__main__":
    key = jax.random.PRNGKey(0)
    k_w, k_x = jax.random.split(key)

    # Small shapes consistent with the module's forward: [B, n_models, in_features]
    B, n_models, in_features, out_features = 8, 4, 32, 32

    weight = init_einlinear_weight(k_w, n_models, out_features, in_features)
    x = jax.random.normal(k_x, (B, n_models, in_features), dtype=jnp.float32)

    ref = jnp.einsum("eoi,bei->beo", weight, x)

    # f32 path (matches the PyTorch module's numerics)
    out = jax.block_until_ready(ein_linear(x, weight))
    assert out.shape == (B, n_models, out_features)
    assert jnp.allclose(out, ref, atol=1e-5, rtol=1e-5)

    # bf16-operand path (v5e/v6e MXU-native); accumulation stays f32 -> loose tol
    out_bf16 = jax.block_until_ready(ein_linear(x, weight, compute_dtype=jnp.bfloat16))
    assert out_bf16.shape == (B, n_models, out_features)
    assert jnp.allclose(out_bf16, ref, atol=5e-2, rtol=5e-2)

    print("KERNEL_OK")
</pallas_src>

<mosaic_0001>
module attributes {stable_mosaic.version = 11 : i64} {
  func.func @_einlinear_kernel(%arg0: i32, %arg1: memref<8x4x32xf32, #tpu.memory_space<vmem>>, %arg2: memref<4x32x32xf32, #tpu.memory_space<vmem>>, %arg3: memref<8x4x32xf32, #tpu.memory_space<vmem>>) attributes {dimension_semantics = [#tpu.dimension_semantics<parallel>], iteration_bounds = array<i64: 1>, scalar_prefetch = 0 : i64, scratch_operands = 0 : i64, tpu.core_type = #tpu.core_type<tc>, window_params = [{transform_indices = @transform_0, window_bounds = array<i64: 8, 4, 32>}, {pipeline_mode = #tpu.pipeline_mode<synchronous>, transform_indices = @transform_1, window_bounds = array<i64: 4, 32, 32>}, {transform_indices = @transform_2, window_bounds = array<i64: 8, 4, 32>}]} {
    %c0 = arith.constant 0 : index
    %c0_0 = arith.constant 0 : index
    %c0_1 = arith.constant 0 : index
    %0 = vector.load %arg1[%c0, %c0_0, %c0_1] : memref<8x4x32xf32, #tpu.memory_space<vmem>>, vector<8x1x32xf32>
    %1 = vector.shape_cast %0 : vector<8x1x32xf32> to vector<8x32xf32>
    %c0_2 = arith.constant 0 : index
    %c0_3 = arith.constant 0 : index
    %c0_4 = arith.constant 0 : index
    %2 = vector.load %arg2[%c0_2, %c0_3, %c0_4] : memref<4x32x32xf32, #tpu.memory_space<vmem>>, vector<1x32x32xf32>
    %3 = vector.shape_cast %2 : vector<1x32x32xf32> to vector<32x32xf32>
    %cst = arith.constant dense<0.000000e+00> : vector<8x32xf32>
    %4 = tpu.matmul %1, %3, %cst {dimension_numbers = #tpu.dot_dimension_numbers<[1], [1], [0], [0], [0, 0, 1, 0], [], []>} : vector<8x32xf32>, vector<32x32xf32>, vector<8x32xf32> -> vector<8x32xf32>
    %c0_5 = arith.constant 0 : index
    %c0_6 = arith.constant 0 : index
    %c0_7 = arith.constant 0 : index
    %5 = vector.load %arg3[%c0_5, %c0_6, %c0_7] : memref<8x4x32xf32, #tpu.memory_space<vmem>>, vector<8x1x32xf32>
    %6 = vector.shape_cast %5 : vector<8x1x32xf32> to vector<8x32xf32>
    %7 = vector.shape_cast %4 : vector<8x32xf32> to vector<8x1x32xf32>
    tpu.vector_store %arg3[%c0_5, %c0_6, %c0_7], %7 {strides = array<i32>} : memref<8x4x32xf32, #tpu.memory_space<vmem>>, vector<8x1x32xf32>,
    %c0_8 = arith.constant 0 : index
    %c1 = arith.constant 1 : index
    %c0_9 = arith.constant 0 : index
    %8 = vector.load %arg1[%c0_8, %c1, %c0_9] : memref<8x4x32xf32, #tpu.memory_space<vmem>>, vector<8x1x32xf32>
    %9 = vector.shape_cast %8 : vector<8x1x32xf32> to vector<8x32xf32>
    %c1_10 = arith.constant 1 : index
    %c0_11 = arith.constant 0 : index
    %c0_12 = arith.constant 0 : index
    %10 = vector.load %arg2[%c1_10, %c0_11, %c0_12] : memref<4x32x32xf32, #tpu.memory_space<vmem>>, vector<1x32x32xf32>
    %11 = vector.shape_cast %10 : vector<1x32x32xf32> to vector<32x32xf32>
    %cst_13 = arith.constant dense<0.000000e+00> : vector<8x32xf32>
    %12 = tpu.matmul %9, %11, %cst_13 {dimension_numbers = #tpu.dot_dimension_numbers<[1], [1], [0], [0], [0, 0, 1, 0], [], []>} : vector<8x32xf32>, vector<32x32xf32>, vector<8x32xf32> -> vector<8x32xf32>
    %c0_14 = arith.constant 0 : index
    %c1_15 = arith.constant 1 : index
    %c0_16 = arith.constant 0 : index
    %13 = vector.load %arg3[%c0_14, %c1_15, %c0_16] : memref<8x4x32xf32, #tpu.memory_space<vmem>>, vector<8x1x32xf32>
    %14 = vector.shape_cast %13 : vector<8x1x32xf32> to vector<8x32xf32>
    %15 = vector.shape_cast %12 : vector<8x32xf32> to vector<8x1x32xf32>
    tpu.vector_store %arg3[%c0_14, %c1_15, %c0_16], %15 {strides = array<i32>} : memref<8x4x32xf32, #tpu.memory_space<vmem>>, vector<8x1x32xf32>,
    %c0_17 = arith.constant 0 : index
    %c2 = arith.constant 2 : index
    %c0_18 = arith.constant 0 : index
    %16 = vector.load %arg1[%c0_17, %c2, %c0_18] : memref<8x4x32xf32, #tpu.memory_space<vmem>>, vector<8x1x32xf32>
    %17 = vector.shape_cast %16 : vector<8x1x32xf32> to vector<8x32xf32>
    %c2_19 = arith.constant 2 : index
    %c0_20 = arith.constant 0 : index
    %c0_21 = arith.constant 0 : index
    %18 = vector.load %arg2[%c2_19, %c0_20, %c0_21] : memref<4x32x32xf32, #tpu.memory_space<vmem>>, vector<1x32x32xf32>
    %19 = vector.shape_cast %18 : vector<1x32x32xf32> to vector<32x32xf32>
    %cst_22 = arith.constant dense<0.000000e+00> : vector<8x32xf32>
    %20 = tpu.matmul %17, %19, %cst_22 {dimension_numbers = #tpu.dot_dimension_numbers<[1], [1], [0], [0], [0, 0, 1, 0], [], []>} : vector<8x32xf32>, vector<32x32xf32>, vector<8x32xf32> -> vector<8x32xf32>
    %c0_23 = arith.constant 0 : index
    %c2_24 = arith.constant 2 : index
    %c0_25 = arith.constant 0 : index
    %21 = vector.load %arg3[%c0_23, %c2_24, %c0_25] : memref<8x4x32xf32, #tpu.memory_space<vmem>>, vector<8x1x32xf32>
    %22 = vector.shape_cast %21 : vector<8x1x32xf32> to vector<8x32xf32>
    %23 = vector.shape_cast %20 : vector<8x32xf32> to vector<8x1x32xf32>
    tpu.vector_store %arg3[%c0_23, %c2_24, %c0_25], %23 {strides = array<i32>} : memref<8x4x32xf32, #tpu.memory_space<vmem>>, vector<8x1x32xf32>,
    %c0_26 = arith.constant 0 : index
    %c3 = arith.constant 3 : index
    %c0_27 = arith.constant 0 : index
    %24 = vector.load %arg1[%c0_26, %c3, %c0_27] : memref<8x4x32xf32, #tpu.memory_space<vmem>>, vector<8x1x32xf32>
    %25 = vector.shape_cast %24 : vector<8x1x32xf32> to vector<8x32xf32>
    %c3_28 = arith.constant 3 : index
    %c0_29 = arith.constant 0 : index
    %c0_30 = arith.constant 0 : index
    %26 = vector.load %arg2[%c3_28, %c0_29, %c0_30] : memref<4x32x32xf32, #tpu.memory_space<vmem>>, vector<1x32x32xf32>
    %27 = vector.shape_cast %26 : vector<1x32x32xf32> to vector<32x32xf32>
    %cst_31 = arith.constant dense<0.000000e+00> : vector<8x32xf32>
    %28 = tpu.matmul %25, %27, %cst_31 {dimension_numbers = #tpu.dot_dimension_numbers<[1], [1], [0], [0], [0, 0, 1, 0], [], []>} : vector<8x32xf32>, vector<32x32xf32>, vector<8x32xf32> -> vector<8x32xf32>
    %c0_32 = arith.constant 0 : index
    %c3_33 = arith.constant 3 : index
    %c0_34 = arith.constant 0 : index
    %29 = vector.load %arg3[%c0_32, %c3_33, %c0_34] : memref<8x4x32xf32, #tpu.memory_space<vmem>>, vector<8x1x32xf32>
    %30 = vector.shape_cast %29 : vector<8x1x32xf32> to vector<8x32xf32>
    %31 = vector.shape_cast %28 : vector<8x32xf32> to vector<8x1x32xf32>
    tpu.vector_store %arg3[%c0_32, %c3_33, %c0_34], %31 {strides = array<i32>} : memref<8x4x32xf32, #tpu.memory_space<vmem>>, vector<8x1x32xf32>,
    return
  }
  func.func @transform_0(%arg0: i32) -> (i32, i32, i32) {
    %c0_i32 = arith.constant 0 : i32
    %c0_i32_0 = arith.constant 0 : i32
    %c0_i32_1 = arith.constant 0 : i32
    return %arg0, %c0_i32, %c0_i32_0 : i32, i32, i32
  }
  func.func @transform_1(%arg0: i32) -> (i32, i32, i32) {
    %c0_i32 = arith.constant 0 : i32
    %c0_i32_0 = arith.constant 0 : i32
    %c0_i32_1 = arith.constant 0 : i32
    %c0_i32_2 = arith.constant 0 : i32
    return %c0_i32, %c0_i32_0, %c0_i32_1 : i32, i32, i32
  }
  func.func @transform_2(%arg0: i32) -> (i32, i32, i32) {
    %c0_i32 = arith.constant 0 : i32
    %c0_i32_0 = arith.constant 0 : i32
    %c0_i32_1 = arith.constant 0 : i32
    return %arg0, %c0_i32, %c0_i32_0 : i32, i32, i32
  }
}

</mosaic_0001>

<bundles_post_ra>
// kernel: tpu_custom_call.1
= control target key start
LH: loop header
LB: loop body
LE: loop exit
PB: predicated region body
PF: predicated region fallthrough
CT: control target
= control target key end

     0   :  { %7 = vsyncpa [#allocation3], 0  ;;  %s662_s0 = inlined_call_operand.hbm [shape: f32[8,4,32], index: 0, kind: input, shape index: {}]   ;;  %s663_s1 = inlined_call_operand.hbm [shape: f32[4,32,32], index: 1, kind: input, shape index: {}]   ;;  %s664_s2 = inlined_call_operand.hbm [shape: f32[8,4,32], index: 2, kind: output, shape index: {}]  }
   0x1   :  { %8 = vsyncpa [#allocation6], 0 }
   0x2   :  { %9 = vsyncpa [#allocation4], 0  ;;  %s14_s11 = sshll.u32 %s662_s0, 4  ;;  %s545_s12 = smov [#allocation2]   ;;  %s15_s11 = int_to_ptr.hbm [resolvable:$true] %s14_s11 }
   0x3   :  { %s16_s13 = sshll.u32 %s545_s12, 4  ;;  %s27_s16 = sshll.u32 %s663_s1, 4  ;;  %s17_s13 = int_to_ptr.vmem [resolvable:$true] %s16_s13  ;;  %s28_s16 = int_to_ptr.hbm [resolvable:$true] %s27_s16 }
   0x4   :  { %s546_s17 = smov 64   ;;  %s547_s18 = smov 4  }
   0x5   :  { %22 = dma.hbm_to_vmem [thread:$0]  %s15_s11, 512, %s17_s13, [#allocation3], %s546_s17, %s546_s17, %s547_s18  }
   0x6   :  { %s548_s19 = smov [#allocation5]   ;;  %s549_s21 = smov 128  }
   0x7   :  { %s29_s20 = sshll.u32 %s548_s19, 4  ;;  %s550_s0 = smov 8   ;;  %s30_s20 = int_to_ptr.vmem [resolvable:$true] %s29_s20 }
   0x8   :  { %35 = dma.hbm_to_vmem [thread:$0]  %s28_s16, 2048, %s30_s20, [#allocation6], %s549_s21, %s549_s21, %s550_s0  }
   0x9   :  { %539 = dma.done.wait [#allocation3], 512  }
   0xa   :  { %540 = vsyncadd [#allocation3], 4294966784 }
   0xb   :  { %541 = dma.done.wait [#allocation6], 2048  }
   0xc   :  { %542 = vsyncadd [#allocation6], 4294965248  ;;  %vm85_vm0 = vcmask 261120   ;;  %v248_v0 = vld [vmem:[#allocation5 + $0x58] sm:$0xff]  ;;  %v247_v4 = vld [vmem:[#allocation5 + $0x50] sm:$0xff]  ;;  %vm65_vm1 = vcmask 1041409  }
   0xd   :  { %v340_v1 = vld [vmem:[#allocation5 + $0x78] sm:$0xff]  ;;  %450 = vmatpush.xpose.msk.msra.mxu2 %vm85_vm0, %v248_v0  ;;  %v339_v5 = vld [vmem:[#allocation5 + $0x70] sm:$0xff]  ;;  %vm68_vm2 = vcmask 1042434   ;;  %vm71_vm3 = vcmask 1043459   ;;  %vm74_vm4 = vcmask 1044484   ;;  %v246_v8 = vld [vmem:[#allocation5 + $0x48] sm:$0xff] }
   0xe   :  { %455 = vmatpush.xpose.msk.msra.mxu3 %vm85_vm0, %v340_v1  ;;  %v55_v2 = vld [vmem:[#allocation5 + $0x18] sm:$0xff]  ;;  %v54_v6 = vld [vmem:[#allocation5 + $0x10] sm:$0xff]  ;;  %v338_v9 = vld [vmem:[#allocation5 + $0x68] sm:$0xff]  ;;  %vm77_vm5 = vcmask 1045509   ;;  %vm80_vm6 = vcmask 1046534   ;;  %vm83_vm7 = vcmask 1047559  }
   0xf   :  { %v156_v3 = vld [vmem:[#allocation5 + $0x38] sm:$0xff]  ;;  %440 = vmatpush.xpose.msk.msra.mxu0 %vm85_vm0, %v55_v2  ;;  %v155_v7 = vld [vmem:[#allocation5 + $0x30] sm:$0xff]  ;;  %v236_v10 = vld [vmem:[#allocation2 + $0x2] sm:$0x1]  ;;  %vm135_vm8 = vcmask 253952   ;;  %s551_s1 = smov [#allocation7]  }
  0x10   :  { %445 = vmatpush.xpose.msk.msra.mxu1 %vm85_vm0, %v156_v3  ;;  %v53_v11 = vld [vmem:[#allocation5 + $0x8] sm:$0xff]  ;;  %v237_v12 = vld [vmem:[#allocation2 + $0x6] sm:$0x1]  ;;  %v240_v15 = vld [vmem:[#allocation2 + $0x12] sm:$0x1]  ;;  %s424_s22 = sshll.u32 %s551_s1, 4  ;;  %s425_s22 = int_to_ptr.vmem [resolvable:$true] %s424_s22 }
  0x11   :  { %451 = vmatpush.xpose.msk.msra.mxu2 %vm85_vm0, %v247_v4  ;;  %v238_v13 = vld [vmem:[#allocation2 + $0xa] sm:$0x1]  ;;  %v239_v14 = vld [vmem:[#allocation2 + $0xe] sm:$0x1]  ;;  %v241_v16 = vld [vmem:[#allocation2 + $0x16] sm:$0x1] }
  0x12   :  { %456 = vmatpush.xpose.msk.msra.mxu3 %vm85_vm0, %v339_v5  ;;  %v242_v17 = vld [vmem:[#allocation2 + $0x1a] sm:$0x1]  ;;  %v154_v18 = vld [vmem:[#allocation5 + $0x28] sm:$0xff]  ;;  %v243_v19 = vld [vmem:[#allocation2 + $0x1e] sm:$0x1]  ;;  %v257_v20 = vrot.slane %v237_v12, 7 }
  0x13   :  { %441 = vmatpush.xpose.msk.msra.mxu0 %vm85_vm0, %v54_v6  ;;  %v259_v21 = vrot.slane %v238_v13, 6  ;;  %v261_v22 = vrot.slane %v239_v14, 5  ;;  %v245_v23 = vld [vmem:[#allocation5 + $0x40] sm:$0xff]  ;;  %v263_v25 = vrot.slane %v240_v15, 4  ;;  %v265_v26 = vrot.slane %v241_v16, 3  ;;  %s426_s25 = sshll.u32 %s664_s2, 4  ;;  %s427_s25 = int_to_ptr.hbm [resolvable:$true] %s426_s25 }
  0x14   :  { %446 = vmatpush.xpose.msk.msra.mxu1 %vm85_vm0, %v155_v7  ;;  %v337_v24 = vld [vmem:[#allocation5 + $0x60] sm:$0xff]  ;;  %v267_v27 = vrot.slane %v242_v17, 2  ;;  %v269_v28 = vrot.slane %v243_v19, 1  ;;  %v258_v30 = vsel %vm65_vm1, %v257_v20, %v236_v10  ;;  %v330_v32 = vld [vmem:[#allocation2 + $0xb] sm:$0x1] }
  0x15   :  { %v328_v29 = vld [vmem:[#allocation2 + $0x3] sm:$0x1]  ;;  %452 = vmatpush.xpose.msk.msra.mxu2 %vm85_vm0, %v246_v8  ;;  %v329_v31 = vld [vmem:[#allocation2 + $0x7] sm:$0x1]  ;;  %v331_v33 = vld [vmem:[#allocation2 + $0xf] sm:$0x1]  ;;  %v260_v35 = vsel %vm68_vm2, %v259_v21, %v258_v30 }
  0x16   :  { %457 = vmatpush.xpose.msk.msra.mxu3 %vm85_vm0, %v338_v9  ;;  %v52_v34 = vld [vmem:[#allocation5] sm:$0xff]  ;;  %v332_v36 = vld [vmem:[#allocation2 + $0x13] sm:$0x1]  ;;  %v333_v37 = vld [vmem:[#allocation2 + $0x17] sm:$0x1]  ;;  %v262_v39 = vsel %vm71_vm3, %v261_v22, %v260_v35  ;;  %v349_v41 = vrot.slane %v329_v31, 7 }
  0x17   :  { %442 = vmatpush.xpose.msk.msra.mxu0 %vm85_vm0, %v53_v11  ;;  %v334_v38 = vld [vmem:[#allocation2 + $0x1b] sm:$0x1]  ;;  %v335_v40 = vld [vmem:[#allocation2 + $0x1f] sm:$0x1]  ;;  %v351_v42 = vrot.slane %v330_v32, 6  ;;  %v353_v43 = vrot.slane %v331_v33, 5  ;;  %v264_v45 = vsel %vm74_vm4, %v263_v25, %v262_v39 }
  0x18   :  { %447 = vmatpush.xpose.msk.msra.mxu1 %vm85_vm0, %v154_v18  ;;  %v153_v44 = vld [vmem:[#allocation5 + $0x20] sm:$0xff]  ;;  %v355_v46 = vrot.slane %v332_v36, 4  ;;  %v357_v47 = vrot.slane %v333_v37, 3  ;;  %v266_v49 = vsel %vm77_vm5, %v265_v26, %v264_v45  ;;  %v350_v50 = vsel %vm65_vm1, %v349_v41, %v328_v29  ;;  %v46_v54 = vld [vmem:[#allocation2 + $0x8] sm:$0x1] }
  0x19   :  { %v44_v48 = vld [vmem:[#allocation2] sm:$0x1]  ;;  %453 = vmatpush.xpose.msk.msra.mxu2 %vm85_vm0, %v245_v23  ;;  %v359_v51 = vrot.slane %v334_v38, 2  ;;  %v361_v52 = vrot.slane %v335_v40, 1  ;;  %v45_v53 = vld [vmem:[#allocation2 + $0x4] sm:$0x1]  ;;  %v268_v55 = vsel %vm80_vm6, %v267_v27, %v266_v49  ;;  %v352_v56 = vsel %vm68_vm2, %v351_v42, %v350_v50 }
  0x1a   :  { %458 = vmatpush.xpose.msk.msra.mxu3 %vm85_vm0, %v337_v24  ;;  %v47_v57 = vld [vmem:[#allocation2 + $0xc] sm:$0x1]  ;;  %v48_v58 = vld [vmem:[#allocation2 + $0x10] sm:$0x1]  ;;  %v49_v59 = vld [vmem:[#allocation2 + $0x14] sm:$0x1]  ;;  %v270_v60 = vsel %vm83_vm7, %v269_v28, %v268_v55  ;;  %v354_v61 = vsel %vm71_vm3, %v353_v43, %v352_v56 }
  0x1b   :  { %443 = vmatpush.xpose.msk.msra.mxu0 %vm85_vm0, %v52_v34  ;;  %v50_v62 = vld [vmem:[#allocation2 + $0x18] sm:$0x1]  ;;  %v51_v63 = vld [vmem:[#allocation2 + $0x1c] sm:$0x1]  ;;  %v64_v0 = vrot.slane %v45_v53, 7  ;;  %v67_v1 = vrot.slane %v46_v54, 6  ;;  %v356_v2 = vsel %vm74_vm4, %v355_v46, %v354_v61 }
  0x1c   :  { %448 = vmatpush.xpose.msk.msra.mxu1 %vm85_vm0, %v153_v44  ;;  %454 = vmatmul.msk.f32.vlgmr.msra.gmra.mxu2 %vm85_vm0, %v270_v60  ;;  %v70_v3 = vrot.slane %v47_v57, 5  ;;  %v73_v4 = vrot.slane %v48_v58, 4  ;;  %v76_v5 = vrot.slane %v49_v59, 3  ;;  %v144_v6 = vld [vmem:[#allocation2 + $0x1] sm:$0x1]  ;;  %v358_v7 = vsel %vm77_vm5, %v357_v47, %v356_v2 }
  0x1d   :  { %v66_v8 = vsel %vm65_vm1, %v64_v0, %v44_v48  ;;  %v79_v9 = vrot.slane %v50_v62, 2  ;;  %v82_v10 = vrot.slane %v51_v63, 1  ;;  %v145_v11 = vld [vmem:[#allocation2 + $0x5] sm:$0x1]  ;;  %v146_v12 = vld [vmem:[#allocation2 + $0x9] sm:$0x1]  ;;  %v360_v13 = vsel %vm80_vm6, %v359_v51, %v358_v7 }
  0x1e   :  { %v69_v14 = vsel %vm68_vm2, %v67_v1, %v66_v8  ;;  %v147_v15 = vld [vmem:[#allocation2 + $0xd] sm:$0x1]  ;;  %v148_v16 = vld [vmem:[#allocation2 + $0x11] sm:$0x1]  ;;  %v149_v17 = vld [vmem:[#allocation2 + $0x15] sm:$0x1]  ;;  %v362_v18 = vsel %vm83_vm7, %v361_v52, %v360_v13 }
  0x1f   :  { %v72_v19 = vsel %vm71_vm3, %v70_v3, %v69_v14  ;;  %v150_v20 = vld [vmem:[#allocation2 + $0x19] sm:$0x1]  ;;  %v165_v21 = vrot.slane %v145_v11, 7  ;;  %v167_v22 = vrot.slane %v146_v12, 6  ;;  %459 = vmatmul.msk.f32.vlgmr.msra.gmra.mxu3 %vm85_vm0, %v362_v18  ;;  %v151_v24 = vld [vmem:[#allocation2 + $0x1d] sm:$0x1] }
  0x20   :  { %v75_v23 = vsel %vm74_vm4, %v73_v4, %v72_v19  ;;  %v169_v25 = vrot.slane %v147_v15, 5  ;;  %v171_v26 = vrot.slane %v148_v16, 4  ;;  %v173_v29 = vrot.slane %v149_v17, 3 }
  0x21   :  { %v78_v27 = vsel %vm77_vm5, %v76_v5, %v75_v23  ;;  %v166_v28 = vsel %vm65_vm1, %v165_v21, %v144_v6  ;;  %v175_v32 = vrot.slane %v150_v20, 2  ;;  %v177_v35 = vrot.slane %v151_v24, 1 }
  0x22   :  { %v81_v30 = vsel %vm80_vm6, %v79_v9, %v78_v27  ;;  %v168_v31 = vsel %vm68_vm2, %v167_v22, %v166_v28 }
  0x23   :  { %v84_v33 = vsel %vm83_vm7, %v82_v10, %v81_v30  ;;  %v170_v34 = vsel %vm71_vm3, %v169_v25, %v168_v31 }
  0x24   :  { %444 = vmatmul.msk.f32.vlgmr.msra.gmra.mxu0 %vm85_vm0, %v84_v33  ;;  %v172_v36 = vsel %vm74_vm4, %v171_v26, %v170_v34 }
  0x25   :  { %v174_v37 = vsel %vm77_vm5, %v173_v29, %v172_v36 }
  0x26   :  { %v176_v38 = vsel %vm80_vm6, %v175_v32, %v174_v37 }
  0x27   :  { %v178_v39 = vsel %vm83_vm7, %v177_v35, %v176_v38 }
  0x28   :  { %449 = vmatmul.msk.f32.vlgmr.msra.gmra.mxu1 %vm85_vm0, %v178_v39 }
  0x9f   :  { %v302_v40 = vpop.f32.mrf.mxu2 }
  0xa0   :  { %v306_v41 = vrot.slane %v302_v40, 1  ;;  %320 = vst.msk [vmem:[#allocation7 + $0x2] sm:$0x1] %vm135_vm8, %v302_v40  ;;  %v307_v58 = vrot.slane %v302_v40, 2  ;;  %v308_v59 = vrot.slane %v302_v40, 3  ;;  %v309_v60 = vrot.slane %v302_v40, 4 }
  0xa1   :  { %v117_v42 = vpop.f32.mrf.mxu0  ;;  %v310_v61 = vrot.slane %v302_v40, 5  ;;  %v311_v62 = vrot.slane %v302_v40, 6  ;;  %v312_v0 = vrot.slane %v302_v40, 7 }
  0xa2   :  { %v121_v43 = vrot.slane %v117_v42, 1  ;;  %v122_v44 = vrot.slane %v117_v42, 2  ;;  %v123_v45 = vrot.slane %v117_v42, 3  ;;  %136 = vst.msk [vmem:[#allocation7] sm:$0x1] %vm135_vm8, %v117_v42  ;;  %v124_v46 = vrot.slane %v117_v42, 4  ;;  %v394_v63 = vpop.f32.mrf.mxu3 }
  0xa3   :  { %321 = vst.msk [vmem:[#allocation7 + $0x6] sm:$0x1] %vm135_vm8, %v306_v41  ;;  %v125_v47 = vrot.slane %v117_v42, 5  ;;  %v126_v48 = vrot.slane %v117_v42, 6  ;;  %v127_v50 = vrot.slane %v117_v42, 7  ;;  %v398_v1 = vrot.slane %v394_v63, 1 }
  0xa4   :  { %137 = vst.msk [vmem:[#allocation7 + $0x4] sm:$0x1] %vm135_vm8, %v121_v43  ;;  %v399_v2 = vrot.slane %v394_v63, 2  ;;  %v400_v3 = vrot.slane %v394_v63, 3  ;;  %v401_v4 = vrot.slane %v394_v63, 4  ;;  %v402_v5 = vrot.slane %v394_v63, 5 }
  0xa5   :  { %138 = vst.msk [vmem:[#allocation7 + $0x8] sm:$0x1] %vm135_vm8, %v122_v44  ;;  %v210_v49 = vpop.f32.mrf.mxu1  ;;  %v403_v6 = vrot.slane %v394_v63, 6  ;;  %v404_v7 = vrot.slane %v394_v63, 7 }
  0xa6   :  { %139 = vst.msk [vmem:[#allocation7 + $0xc] sm:$0x1] %vm135_vm8, %v123_v45  ;;  %v214_v51 = vrot.slane %v210_v49, 1  ;;  %v215_v52 = vrot.slane %v210_v49, 2  ;;  %v216_v53 = vrot.slane %v210_v49, 3  ;;  %v217_v54 = vrot.slane %v210_v49, 4 }
  0xa7   :  { %140 = vst.msk [vmem:[#allocation7 + $0x10] sm:$0x1] %vm135_vm8, %v124_v46  ;;  %v218_v55 = vrot.slane %v210_v49, 5  ;;  %v219_v56 = vrot.slane %v210_v49, 6  ;;  %v220_v57 = vrot.slane %v210_v49, 7 }
  0xa8   :  { %141 = vst.msk [vmem:[#allocation7 + $0x14] sm:$0x1] %vm135_vm8, %v125_v47 }
  0xa9   :  { %142 = vst.msk [vmem:[#allocation7 + $0x18] sm:$0x1] %vm135_vm8, %v126_v48 }
  0xaa   :  { %143 = vst.msk [vmem:[#allocation7 + $0x1c] sm:$0x1] %vm135_vm8, %v127_v50 }
  0xab   :  { %228 = vst.msk [vmem:[#allocation7 + $0x1] sm:$0x1] %vm135_vm8, %v210_v49 }
  0xac   :  { %229 = vst.msk [vmem:[#allocation7 + $0x5] sm:$0x1] %vm135_vm8, %v214_v51 }
  0xad   :  { %230 = vst.msk [vmem:[#allocation7 + $0x9] sm:$0x1] %vm135_vm8, %v215_v52 }
  0xae   :  { %231 = vst.msk [vmem:[#allocation7 + $0xd] sm:$0x1] %vm135_vm8, %v216_v53 }
  0xaf   :  { %232 = vst.msk [vmem:[#allocation7 + $0x11] sm:$0x1] %vm135_vm8, %v217_v54 }
  0xb0   :  { %233 = vst.msk [vmem:[#allocation7 + $0x15] sm:$0x1] %vm135_vm8, %v218_v55 }
  0xb1   :  { %234 = vst.msk [vmem:[#allocation7 + $0x19] sm:$0x1] %vm135_vm8, %v219_v56 }
  0xb2   :  { %235 = vst.msk [vmem:[#allocation7 + $0x1d] sm:$0x1] %vm135_vm8, %v220_v57 }
  0xb3   :  { %322 = vst.msk [vmem:[#allocation7 + $0xa] sm:$0x1] %vm135_vm8, %v307_v58 }
  0xb4   :  { %323 = vst.msk [vmem:[#allocation7 + $0xe] sm:$0x1] %vm135_vm8, %v308_v59 }
  0xb5   :  { %324 = vst.msk [vmem:[#allocation7 + $0x12] sm:$0x1] %vm135_vm8, %v309_v60 }
  0xb6   :  { %325 = vst.msk [vmem:[#allocation7 + $0x16] sm:$0x1] %vm135_vm8, %v310_v61 }
  0xb7   :  { %326 = vst.msk [vmem:[#allocation7 + $0x1a] sm:$0x1] %vm135_vm8, %v311_v62 }
  0xb8   :  { %327 = vst.msk [vmem:[#allocation7 + $0x1e] sm:$0x1] %vm135_vm8, %v312_v0 }
  0xb9   :  { %412 = vst.msk [vmem:[#allocation7 + $0x3] sm:$0x1] %vm135_vm8, %v394_v63 }
  0xba   :  { %413 = vst.msk [vmem:[#allocation7 + $0x7] sm:$0x1] %vm135_vm8, %v398_v1 }
  0xbb   :  { %414 = vst.msk [vmem:[#allocation7 + $0xb] sm:$0x1] %vm135_vm8, %v399_v2 }
  0xbc   :  { %415 = vst.msk [vmem:[#allocation7 + $0xf] sm:$0x1] %vm135_vm8, %v400_v3 }
  0xbd   :  { %416 = vst.msk [vmem:[#allocation7 + $0x13] sm:$0x1] %vm135_vm8, %v401_v4 }
  0xbe   :  { %417 = vst.msk [vmem:[#allocation7 + $0x17] sm:$0x1] %vm135_vm8, %v402_v5 }
  0xbf   :  { %418 = vst.msk [vmem:[#allocation7 + $0x1b] sm:$0x1] %vm135_vm8, %v403_v6 }
  0xc0   :  { %419 = vst.msk [vmem:[#allocation7 + $0x1f] sm:$0x1] %vm135_vm8, %v404_v7 }
  0xc1   :  { %432 = dma.vmem_to_hbm [thread:$0]  %s425_s22, 512, %s427_s25, [#allocation4], %s546_s17, %s546_s17, %s547_s18  }
  0xc2   :  { %543 = dma.done.wait [#allocation4], 512  }
  0xc3   :  { %544 = vsyncadd [#allocation4], 4294966784 }
  0xc4   :  { %437 = vsyncpa [#allocation3], 1 }
  0xc5   :  { %438 = vsyncpa [#allocation6], 1 }
  0xc6   :  { %439 = vsyncpa [#allocation4], 1 }

</bundles_post_ra>
